<compile_context>
chip_gen: v7x
topology: tpu7x:2x2x1
jax: 0.10.0
libtpu: 0.0.40
codegen_flags: <defaults>
</compile_context>

<pallas_src>
import functools

import jax
import jax.numpy as jnp
from jax import lax
from jax.experimental import pallas as pl
from jax.experimental.pallas import tpu as pltpu


def _cdiv(a, b):
    return -(-a // b)


def _sublane(dtype):
    # Minimum second-minor tile granularity: 8 (f32), 16 (bf16), 32 (int8/fp8).
    return max(8, 32 // jnp.dtype(dtype).itemsize)


def _linear_kernel(has_bias, acc_is_out, ragged_k, K_total, compute_dtype, *refs):
    if acc_is_out:
        if has_bias:
            x_ref, w_ref, b_ref, o_ref = refs
        else:
            x_ref, w_ref, o_ref = refs
            b_ref = None
        acc_ref = o_ref  # f32 output doubles as the resident accumulator
    else:
        if has_bias:
            x_ref, w_ref, b_ref, o_ref, acc_ref = refs
        else:
            x_ref, w_ref, o_ref, acc_ref = refs
            b_ref = None

    k = pl.program_id(2)
    nk = pl.num_programs(2)

    xb = x_ref[...]
    wb = w_ref[...]
    if ragged_k:
        # Last K block hangs past the array end: the padded columns of x/w hold
        # undefined VMEM data, so zero both operands' tails before the MXU.
        tk = x_ref.shape[-1]
        valid = K_total - k * tk
        kmask = lax.broadcasted_iota(jnp.int32, (1, tk), 1) < valid
        xb = jnp.where(kmask, xb, 0)
        wb = jnp.where(kmask, wb, 0)
    if compute_dtype is not None:
        xb = xb.astype(compute_dtype)
        wb = wb.astype(compute_dtype)

    # Native (N, K) weight layout: contract K (lane dim) of both operands -> (tm, tn).
    # Mosaic drives the MXU with the transposed RHS push (no per-step XLU transpose).
    partial = lax.dot_general(
        xb,
        wb,
        dimension_numbers=(((1,), (1,)), ((), ())),
        preferred_element_type=jnp.float32,
    )

    @pl.when(k == 0)
    def _():
        # First K step writes the partial product directly — saves a zero-init store
        # pass and a read-add pass per output tile.
        acc_ref[...] = partial.astype(acc_ref.dtype)

    @pl.when(k != 0)
    def _():
        acc_ref[...] += partial.astype(acc_ref.dtype)

    if has_bias or not acc_is_out:
        @pl.when(k == nk - 1)
        def _():
            acc = acc_ref[...].astype(jnp.float32)
            if has_bias:
                acc = acc + b_ref[...].astype(jnp.float32)
            o_ref[...] = acc.astype(o_ref.dtype)


def _pick_tiles(M, N, K, x_dt, w_dt, out_dt, b_dt, has_bias, vmem_cap):
    xi = jnp.dtype(x_dt).itemsize
    wi = jnp.dtype(w_dt).itemsize
    oi = jnp.dtype(out_dt).itemsize
    bi = jnp.dtype(b_dt).itemsize if has_bias else 0
    m_align = max(_sublane(x_dt), _sublane(out_dt))
    acc_is_out = jnp.dtype(out_dt) == jnp.dtype(jnp.float32)

    # Double-buffered working set budget: ~45 MiB on v7x (64 MiB), ~90 MiB on v5e/v6e.
    budget = min(int(vmem_cap * 0.70), 96 << 20)

    def vmem_bytes(tm, tn, tk):
        acc = 0 if acc_is_out else tm * tn * 4
        return (2 * tm * tk * xi + 2 * tn * tk * wi + 2 * tm * tn * oi
                + acc + 2 * tn * bi)

    def clamp(dim, pref, align):
        if dim <= pref:
            return dim  # full-extent block is always legal
        return max(align, (pref // align) * align)

    # Large tm/tn maximise HBM reuse (intensity ~ tm*tn/(tm+tn)).
    tm = clamp(M, 1024, m_align)
    tn = clamp(N, 1024, 128)
    if tn < N and tn > 256 and tn % 256:
        tn = (tn // 256) * 256  # 256-granular for the 2x256x256 MXUs (v6e/v7x)

    # v7x megacore: guarantee >= 2 parallel tiles for decode-style small-M shapes.
    if _cdiv(M, tm) * _cdiv(N, tn) < 2 and N >= 256:
        tn = 128 * _cdiv(_cdiv(N, 2), 128)

    # K tile: biggest that still fits (full K preferred -> collapses the K loop).
    k_cands = [K] + [c for c in (4096, 2048, 1536, 1024, 768, 512, 384, 256, 128)
                     if c < K]
    while True:
        tk = None
        for c in k_cands:
            cc = K if c >= K else max(128, (c // 128) * 128)
            if vmem_bytes(tm, tn, cc) <= budget:
                tk = cc
                break
        if tk is not None:
            return tm, tn, tk
        # Still over budget: shrink the larger parallel tile and retry.
        if tm > m_align and (tm >= tn or tn <= 128):
            tm = max(m_align, ((tm // 2) // m_align) * m_align)
        elif tn > 128:
            tn = max(128, ((tn // 2) // 128) * 128)
        else:
            return tm, tn, min(K, 128)


def native_linear(x, weight, bias=None, *, tiles=None, compute_dtype=None):
    """F.linear(x, weight, bias): x [..., K], weight [N, K], bias [N] -> [..., N]."""
    K = x.shape[-1]
    N, K_w = weight.shape
    assert K == K_w, f"in_features mismatch: {K} vs {K_w}"
    orig_shape = x.shape
    x2d = x.reshape(-1, K)
    M = x2d.shape[0]
    out_dtype = x.dtype
    has_bias = bias is not None

    # Lane-dense output: pad tiny N up to 128 so stores stay unmasked; slice after.
    N_out = N
    if N < 128:
        weight = jnp.pad(weight, ((0, 128 - N), (0, 0)))
        if has_bias:
            bias = jnp.pad(bias, (0, 128 - N))
        N = 128

    try:
        vmem_cap = pltpu.get_tpu_info().vmem_capacity_bytes
    except Exception:
        vmem_cap = 64 << 20  # conservative fallback (v7x)

    b_dt = bias.dtype if has_bias else jnp.float32
    if tiles is None:
        tm, tn, tk = _pick_tiles(M, N, K, x2d.dtype, weight.dtype, out_dtype,
                                 b_dt, has_bias, vmem_cap)
    else:
        tm, tn, tk = (min(t, d) for t, d in zip(tiles, (M, N, K)))

    acc_is_out = jnp.dtype(out_dtype) == jnp.dtype(jnp.float32)
    ragged_k = (K % tk) != 0
    grid = (_cdiv(M, tm), _cdiv(N, tn), _cdiv(K, tk))

    in_specs = [
        pl.BlockSpec((tm, tk), lambda i, j, k: (i, k)),  # activations
        pl.BlockSpec((tn, tk), lambda i, j, k: (j, k)),  # weight, native (N, K)
    ]
    args = [x2d, weight]
    if has_bias:
        in_specs.append(pl.BlockSpec((1, tn), lambda i, j, k: (0, j)))
        args.append(bias.reshape(1, N))

    out_spec = pl.BlockSpec((tm, tn), lambda i, j, k: (i, j))
    scratch_shapes = [] if acc_is_out else [pltpu.VMEM((tm, tn), jnp.float32)]

    # VMEM scoped limit: double-buffered working set + margin, clamped to physical.
    est_vmem = (
        2 * tm * tk * x2d.dtype.itemsize
        + 2 * tn * tk * weight.dtype.itemsize
        + 2 * tm * tn * jnp.dtype(out_dtype).itemsize
        + (0 if acc_is_out else tm * tn * 4)
        + (2 * tn * jnp.dtype(b_dt).itemsize if has_bias else 0)
    )
    vmem_limit = min(vmem_cap, max(32 << 20, int(est_vmem * 1.3) + (4 << 20)))

    m_tiles, n_tiles = grid[0], grid[1]
    cost = pl.CostEstimate(
        flops=2 * M * N * K,
        transcendentals=0,
        bytes_accessed=(
            M * K * x2d.dtype.itemsize * n_tiles            # x streamed once per N tile
            + N * K * weight.dtype.itemsize * m_tiles       # W streamed once per M tile
            + M * N * jnp.dtype(out_dtype).itemsize         # output written once
            + (N * jnp.dtype(b_dt).itemsize * m_tiles if has_bias else 0)
        ),
    )

    kernel = functools.partial(_linear_kernel, has_bias, acc_is_out, ragged_k,
                               K, compute_dtype)

    out2d = pl.pallas_call(
        kernel,
        out_shape=jax.ShapeDtypeStruct((M, N), out_dtype),
        grid_spec=pltpu.PrefetchScalarGridSpec(
            num_scalar_prefetch=0,
            grid=grid,
            in_specs=in_specs,
            out_specs=out_spec,
            scratch_shapes=scratch_shapes,
        ),
        compiler_params=pltpu.CompilerParams(
            dimension_semantics=("parallel", "parallel", "arbitrary"),
            vmem_limit_bytes=vmem_limit,
        ),
        cost_estimate=cost,
    )(*args)

    if N_out != N:
        out2d = out2d[:, :N_out]
    return out2d.reshape(*orig_shape[:-1], N_out)


if __name__ == "__main__":
    key = jax.random.PRNGKey(0)
    kx, kw, kb, kx2, kw2, kx3, kw3, kb3 = jax.random.split(key, 8)

    # 1) Small f32 shapes consistent with NativeLinear: batch=2, seq=8, hidden=32 -> 64.
    #    Exercises the N<128 lane-dense padding path and the bias path.
    batch, seq, in_features, out_features = 2, 8, 32, 64
    x = jax.random.normal(kx, (batch, seq, in_features), dtype=jnp.float32)
    weight = jax.random.normal(kw, (out_features, in_features), dtype=jnp.float32) * 0.05
    bias = jax.random.normal(kb, (out_features,), dtype=jnp.float32) * 0.1

    out = jax.block_until_ready(native_linear(x, weight, bias))
    ref = x @ weight.T + bias
    assert out.shape == (batch, seq, out_features)
    assert jnp.allclose(out, ref, atol=1e-3, rtol=1e-3), float(jnp.max(jnp.abs(out - ref)))

    # 2) Forced small tiles: multi-step K loop with a ragged last K block (320 % 128 != 0),
    #    f32 accumulate-into-output path, no bias, multi-tile M/N grid.
    M2, K2, N2 = 256, 320, 256
    x2 = jax.random.normal(kx2, (M2, K2), dtype=jnp.float32)
    w2 = jax.random.normal(kw2, (N2, K2), dtype=jnp.float32) * 0.05
    out2 = jax.block_until_ready(native_linear(x2, w2, None, tiles=(128, 128, 128)))
    ref2 = jnp.dot(x2, w2.T, precision=jax.lax.Precision.HIGHEST)
    assert out2.shape == (M2, N2)
    assert jnp.allclose(out2, ref2, atol=5e-2, rtol=2e-2), float(jnp.max(jnp.abs(out2 - ref2)))

    # 3) bf16 path: f32 scratch accumulator + bias, auto tiles (megacore N split).
    M3, K3, N3 = 128, 256, 256
    x3 = (jax.random.normal(kx3, (M3, K3), dtype=jnp.float32)).astype(jnp.bfloat16)
    w3 = (jax.random.normal(kw3, (N3, K3), dtype=jnp.float32) * 0.05).astype(jnp.bfloat16)
    b3 = (jax.random.normal(kb3, (N3,), dtype=jnp.float32) * 0.1).astype(jnp.bfloat16)
    out3 = jax.block_until_ready(native_linear(x3, w3, b3))
    ref3 = (x3.astype(jnp.float32) @ w3.astype(jnp.float32).T) + b3.astype(jnp.float32)
    assert out3.shape == (M3, N3)
    assert jnp.allclose(out3.astype(jnp.float32), ref3, atol=2e-2, rtol=2e-2), float(
        jnp.max(jnp.abs(out3.astype(jnp.float32) - ref3)))

    print("KERNEL_OK")
</pallas_src>

<mosaic_0001>
module attributes {stable_mosaic.version = 11 : i64} {
  func.func @_linear_kernel(%arg0: i32, %arg1: i32, %arg2: i32, %arg3: memref<16x32xf32, #tpu.memory_space<vmem>>, %arg4: memref<128x32xf32, #tpu.memory_space<vmem>>, %arg5: memref<1x128xf32, #tpu.memory_space<vmem>>, %arg6: memref<16x128xf32, #tpu.memory_space<vmem>>) attributes {dimension_semantics = [#tpu.dimension_semantics<parallel>, #tpu.dimension_semantics<parallel>, #tpu.dimension_semantics<arbitrary>], iteration_bounds = array<i64: 1, 1, 1>, scalar_prefetch = 0 : i64, scratch_operands = 0 : i64, tpu.core_type = #tpu.core_type<tc>, window_params = [{transform_indices = @transform_0, window_bounds = array<i64: 16, 32>}, {transform_indices = @transform_1, window_bounds = array<i64: 128, 32>}, {transform_indices = @transform_2, window_bounds = array<i64: 1, 128>}, {transform_indices = @transform_3, window_bounds = array<i64: 16, 128>}]} {
    %c0 = arith.constant 0 : index
    %c0_0 = arith.constant 0 : index
    %0 = vector.load %arg3[%c0, %c0_0] : memref<16x32xf32, #tpu.memory_space<vmem>>, vector<16x32xf32>
    %c0_1 = arith.constant 0 : index
    %c0_2 = arith.constant 0 : index
    %1 = vector.load %arg4[%c0_1, %c0_2] : memref<128x32xf32, #tpu.memory_space<vmem>>, vector<128x32xf32>
    %cst = arith.constant dense<0.000000e+00> : vector<16x128xf32>
    %2 = tpu.matmul %0, %1, %cst {dimension_numbers = #tpu.dot_dimension_numbers<[1], [1], [0], [0], [0, 0, 1, 0], [], []>} : vector<16x32xf32>, vector<128x32xf32>, vector<16x128xf32> -> vector<16x128xf32>
    %c0_i32 = arith.constant 0 : i32
    %3 = arith.cmpi eq, %arg2, %c0_i32 : i32
    %4 = arith.extui %3 : i1 to i32
    %c0_i32_3 = arith.constant 0 : i32
    %5 = arith.cmpi ne, %4, %c0_i32_3 : i32
    scf.if %5 {
      %c0_8 = arith.constant 0 : index
      %c0_9 = arith.constant 0 : index
      %12 = vector.load %arg6[%c0_8, %c0_9] : memref<16x128xf32, #tpu.memory_space<vmem>>, vector<16x128xf32>
      tpu.vector_store %arg6[%c0_8, %c0_9], %2 {strides = array<i32>} : memref<16x128xf32, #tpu.memory_space<vmem>>, vector<16x128xf32>,
    } else {
    }
    %c0_i32_4 = arith.constant 0 : i32
    %6 = arith.cmpi ne, %arg2, %c0_i32_4 : i32
    %7 = arith.extui %6 : i1 to i32
    %c0_i32_5 = arith.constant 0 : i32
    %8 = arith.cmpi ne, %7, %c0_i32_5 : i32
    scf.if %8 {
      %c0_8 = arith.constant 0 : index
      %c0_9 = arith.constant 0 : index
      %12 = vector.load %arg6[%c0_8, %c0_9] : memref<16x128xf32, #tpu.memory_space<vmem>>, vector<16x128xf32>
      %13 = arith.addf %12, %2 : vector<16x128xf32>
      %c0_10 = arith.constant 0 : index
      %c0_11 = arith.constant 0 : index
      %14 = vector.load %arg6[%c0_10, %c0_11] : memref<16x128xf32, #tpu.memory_space<vmem>>, vector<16x128xf32>
      tpu.vector_store %arg6[%c0_10, %c0_11], %13 {strides = array<i32>} : memref<16x128xf32, #tpu.memory_space<vmem>>, vector<16x128xf32>,
    } else {
    }
    %c0_i32_6 = arith.constant 0 : i32
    %9 = arith.cmpi eq, %arg2, %c0_i32_6 : i32
    %10 = arith.extui %9 : i1 to i32
    %c0_i32_7 = arith.constant 0 : i32
    %11 = arith.cmpi ne, %10, %c0_i32_7 : i32
    scf.if %11 {
      %c0_8 = arith.constant 0 : index
      %c0_9 = arith.constant 0 : index
      %12 = vector.load %arg6[%c0_8, %c0_9] : memref<16x128xf32, #tpu.memory_space<vmem>>, vector<16x128xf32>
      %c0_10 = arith.constant 0 : index
      %c0_11 = arith.constant 0 : index
      %13 = vector.load %arg5[%c0_10, %c0_11] : memref<1x128xf32, #tpu.memory_space<vmem>>, vector<1x128xf32>
      %14 = vector.broadcast %13 : vector<1x128xf32> to vector<16x128xf32>
      %15 = arith.addf %12, %14 : vector<16x128xf32>
      %c0_12 = arith.constant 0 : index
      %c0_13 = arith.constant 0 : index
      %16 = vector.load %arg6[%c0_12, %c0_13] : memref<16x128xf32, #tpu.memory_space<vmem>>, vector<16x128xf32>
      tpu.vector_store %arg6[%c0_12, %c0_13], %15 {strides = array<i32>} : memref<16x128xf32, #tpu.memory_space<vmem>>, vector<16x128xf32>,
    } else {
    }
    return
  }
  func.func @transform_0(%arg0: i32, %arg1: i32, %arg2: i32) -> (i32, i32) {
    %c0_i32 = arith.constant 0 : i32
    return %arg0, %arg2 : i32, i32
  }
  func.func @transform_1(%arg0: i32, %arg1: i32, %arg2: i32) -> (i32, i32) {
    %c0_i32 = arith.constant 0 : i32
    return %arg1, %arg2 : i32, i32
  }
  func.func @transform_2(%arg0: i32, %arg1: i32, %arg2: i32) -> (i32, i32) {
    %c0_i32 = arith.constant 0 : i32
    %c0_i32_0 = arith.constant 0 : i32
    return %c0_i32, %arg1 : i32, i32
  }
  func.func @transform_3(%arg0: i32, %arg1: i32, %arg2: i32) -> (i32, i32) {
    %c0_i32 = arith.constant 0 : i32
    return %arg0, %arg1 : i32, i32
  }
}

</mosaic_0001>

<bundles_post_ra>
// kernel: tpu_custom_call.1
= control target key start
LH: loop header
LB: loop body
LE: loop exit
PB: predicated region body
PF: predicated region fallthrough
CT: control target
= control target key end

     0   :  { %vm33_vm0 = vcmask 261120   ;;  %s490_s0 = inlined_call_operand.vmem [shape: f32[16,32], index: 0, kind: input, shape index: {}]   ;;  %s491_s1 = inlined_call_operand.vmem [shape: f32[128,32], index: 1, kind: input, shape index: {}]   ;;  %s492_s2 = inlined_call_operand.vmem [shape: f32[1,128], index: 2, kind: input, shape index: {}]   ;;  %s493_s3 = inlined_call_operand.hbm [shape: f32[16,128], index: 3, kind: output, shape index: {}]  }
   0x1   :  { %v17_v0 = vld [vmem:[%s491_s1] sm:$0xff]  ;;  %v18_v1 = vld [vmem:[%s491_s1 + $0x8] sm:$0xff]  ;;  %v19_v2 = vld [vmem:[%s491_s1 + $0x10] sm:$0xff] }
   0x2   :  { %v283_v3 = vpack.c.bf16 %v18_v1, %v17_v0  ;;  %vm392_vm1 = vmpackc.low %vm33_vm0, %vm33_vm0  ;;  %v20_v5 = vld [vmem:[%s491_s1 + $0x18] sm:$0xff]  ;;  %v15_v7 = vld [vmem:[%s490_s0] sm:$0xff] }
   0x3   :  { %v289_v6 = vpack.c.bf16 %v20_v5, %v19_v2  ;;  %v21_v8 = vld [vmem:[%s491_s1 + $0x20] sm:$0xff]  ;;  %v22_v9 = vld [vmem:[%s491_s1 + $0x28] sm:$0xff]  ;;  %280 = vmatprep.mubr.msk.f32.mxu0 %vm33_vm0, %v15_v7 }
   0x4   :  { %285 = vmatprep.subr.msk.bf16.mxu0 %vm392_vm1, %v283_v3 }
   0x5   :  { %288 = vmatpush3.bf16.xpose.msk.msra.mxu0 %vm392_vm1, %v283_v3 }
   0x6   :  { %291 = vmatprep.subr.msk.bf16.mxu0 %vm392_vm1, %v289_v6 }
   0x7   :  { %8 = vsyncpa [#allocation3], 0  ;;  %v295_v10 = vpack.c.bf16 %v22_v9, %v21_v8  ;;  %v23_v11 = vld [vmem:[%s491_s1 + $0x30] sm:$0xff]  ;;  %v24_v12 = vld [vmem:[%s491_s1 + $0x38] sm:$0xff] }
   0x8   :  { %v301_v13 = vpack.c.bf16 %v24_v12, %v23_v11  ;;  %v25_v14 = vld [vmem:[%s491_s1 + $0x40] sm:$0xff]  ;;  %v26_v15 = vld [vmem:[%s491_s1 + $0x48] sm:$0xff]  ;;  %v27_v17 = vld [vmem:[%s491_s1 + $0x50] sm:$0xff] }
   0x9   :  { %v307_v16 = vpack.c.bf16 %v26_v15, %v25_v14  ;;  %v28_v18 = vld [vmem:[%s491_s1 + $0x58] sm:$0xff]  ;;  %v29_v20 = vld [vmem:[%s491_s1 + $0x60] sm:$0xff]  ;;  %v30_v21 = vld [vmem:[%s491_s1 + $0x68] sm:$0xff] }
   0xa   :  { %v313_v19 = vpack.c.bf16 %v28_v18, %v27_v17  ;;  %v319_v22 = vpack.c.bf16 %v30_v21, %v29_v20  ;;  %v31_v23 = vld [vmem:[%s491_s1 + $0x70] sm:$0xff]  ;;  %v32_v24 = vld [vmem:[%s491_s1 + $0x78] sm:$0xff]  ;;  %v16_v26 = vld [vmem:[%s490_s0 + $0x8] sm:$0xff]  ;;  %s358_s1 = smov [#allocation2]  }
   0xb   :  { %v325_v25 = vpack.c.bf16 %v32_v24, %v31_v23  ;;  %v229_v27 = vld [vmem:[%s492_s2] ss:$0 sm:$0xff]  ;;  %s200_s23 = sshll.u32 %s358_s1, 4  ;;  %s201_s23 = int_to_ptr.vmem [resolvable:$true] %s200_s23 }
   0xc   :  { %s334_s24 = scalar_lea.vmem %s201_s23, 256  ;;  %p339_p1 = scmp.lt.s32.totalorder %s201_s23, %s201_s23 }
   0xd   :  { %294 = vmatpush3.bf16.xpose.msk.msra.mxu0 %vm392_vm1, %v289_v6  ;;  %p335_p0 = scmp.ne.s32.totalorder %s201_s23, %s334_s24  ;;  %p340_p2 = scmp.lt.s32.totalorder %s334_s24, %s334_s24 }
   0xe   :  { %297 = vmatprep.subr.msk.bf16.mxu0 %vm392_vm1, %v295_v10 }
   0xf   :  { %p341_p3 = por %p340_p2, %p339_p1 }
  0x11   :  { %p342_p4 = pnand %p341_p3, %p335_p0 }
  0x15   :  { %300 = vmatpush3.bf16.xpose.msk.msra.mxu0 %vm392_vm1, %v295_v10 }
  0x16   :  { %303 = vmatprep.subr.msk.bf16.mxu0 %vm392_vm1, %v301_v13 }
  0x1d   :  { %306 = vmatpush3.bf16.xpose.msk.msra.mxu0 %vm392_vm1, %v301_v13 }
  0x1e   :  { %309 = vmatprep.subr.msk.bf16.mxu0 %vm392_vm1, %v307_v16 }
  0x25   :  { %312 = vmatpush3.bf16.xpose.msk.msra.mxu0 %vm392_vm1, %v307_v16 }
  0x26   :  { %315 = vmatprep.subr.msk.bf16.mxu0 %vm392_vm1, %v313_v19 }
  0x2d   :  { %318 = vmatpush3.bf16.xpose.msk.msra.mxu0 %vm392_vm1, %v313_v19 }
  0x2e   :  { %321 = vmatprep.subr.msk.bf16.mxu0 %vm392_vm1, %v319_v22 }
  0x35   :  { %324 = vmatpush3.bf16.xpose.msk.msra.mxu0 %vm392_vm1, %v319_v22 }
  0x36   :  { %327 = vmatprep.subr.msk.bf16.mxu0 %vm392_vm1, %v325_v25 }
  0x3d   :  { %330 = vmatpush3.bf16.xpose.msk.msra.mxu0 %vm392_vm1, %v325_v25 }
  0x44   :  { %281 = vmatmul.mubr.msk.f32.vlgmr.msra.gmra.mrb[0].mxu0 %vm33_vm0, %v16_v26 }
 0x117   :  { %v282_v28 = vpop.f32.mrb[0].mxu0 }
 0x118   :  { %v192_v29 = vadd.f32 %v282_v28, %v229_v27  ;;  %v154_v30 = vpop.f32.mrb[1].mxu0 }
 0x119   :  { %v191_v31 = vadd.f32 %v229_v27, %v154_v30 }
 0x11a   :  { %194 = vst [vmem:[#allocation2 + $0x8] sm:$0xff] %v192_v29 }
 0x11b   :  { %193 = vst [vmem:[#allocation2] sm:$0xff] %v191_v31 }
 0x11c   :  { %345 = shalt.err (!%p342_p4)
}
 0x11d   :  { %s346_s2 = scalar_lea.hbm %s493_s3, 256 }
 0x11e   :  { %p347_p5 = scmp.ne.s32.totalorder %s493_s3, %s346_s2  ;;  %p350_p6 = scmp.lt.u32.totalorder %s346_s2, %s493_s3 }
 0x120   :  { %p352_p7 = pnand %p350_p6, %p347_p5 }
 0x122   :  { %355 = shalt.err (!%p352_p7)
}
 0x123   :  { %s359_s30 = smov 128   ;;  %s360_s4 = smov 8  }
 0x124   :  { %206 = dma.vmem_to_hbm [thread:$0]  %s201_s23, 256, %s493_s3, [#allocation3], %s359_s30, %s359_s30, %s360_s4  }
 0x125   :  { %356 = dma.done.wait [#allocation3], 256  }
 0x126   :  { %357 = vsyncadd [#allocation3], 4294967040 }
 0x127   :  { %210 = vsyncpa [#allocation3], 1 }

</bundles_post_ra>
